<compile_context>
chip_gen: v5e
topology: v5e:2x2
jax: 0.10.0
libtpu: 0.0.40
codegen_flags: <defaults>
</compile_context>

<pallas_src>
import functools

import jax
import jax.numpy as jnp
from jax.experimental import pallas as pl
from jax.experimental.pallas import tpu as pltpu


# ----------------------------- Linear kernel ------------------------------- #
def _linear_kernel(x_ref, w_ref, b_ref, o_ref, acc_ref):
    # x: (tm, tk) bf16, w: (tk, tn) bf16, b: (1, tn) f32,
    # o: (tm, tn) out_dtype, acc: (tm, tn) f32.
    @pl.when(pl.program_id(2) == 0)
    def _init():
        acc_ref[...] = jnp.zeros_like(acc_ref)

    acc_ref[...] += jnp.dot(x_ref[...], w_ref[...],
                            preferred_element_type=jnp.float32)

    @pl.when(pl.program_id(2) == pl.num_programs(2) - 1)
    def _finalize():
        o_ref[...] = (acc_ref[...] + b_ref[...].astype(jnp.float32)
                      ).astype(o_ref.dtype)


def _pick_tile(dim, prefs):
    """Largest preferred tile that evenly divides `dim`; else the full dim.

    Preference lists go down to small multiples of the sublane/lane units so
    that the full-dim fallback only triggers for dims where the layout rules
    force it (last/contraction dims that are not 128-multiples).
    """
    for p in prefs:
        if dim >= p and dim % p == 0:
            return p
    return dim


def linear(x2d, w, b, *, out_dtype=None):
    """x2d: (R, Cin) bf16, w: (Cin, Cout) bf16 (torch weight transposed), b: (Cout,) f32."""
    R, Cin = x2d.shape
    Cout = w.shape[1]
    out_dtype = x2d.dtype if out_dtype is None else out_dtype

    # 256-wide tiles fill the v6e/v7x 256x256 MXU; smaller fall-backs keep
    # odd/small dims compiling with modest VMEM tiles.
    tm = _pick_tile(R, (256, 128, 64, 32, 16, 8))
    tn = _pick_tile(Cout, (256, 128))        # must stay 128-aligned (lanes)
    tk = _pick_tile(Cin, (512, 256, 128))    # must stay 128-aligned (lanes)
    grid = (R // tm, Cout // tn, Cin // tk)

    b2d = b.reshape(1, Cout).astype(jnp.float32)

    flops = 2 * R * Cin * Cout
    bytes_accessed = (R * Cin * x2d.dtype.itemsize
                      + Cin * Cout * w.dtype.itemsize
                      + Cout * 4
                      + R * Cout * jnp.dtype(out_dtype).itemsize)

    return pl.pallas_call(
        _linear_kernel,
        out_shape=jax.ShapeDtypeStruct((R, Cout), out_dtype),
        grid_spec=pltpu.PrefetchScalarGridSpec(
            num_scalar_prefetch=0,
            grid=grid,
            in_specs=[
                pl.BlockSpec((tm, tk), lambda i, j, k: (i, k)),
                pl.BlockSpec((tk, tn), lambda i, j, k: (k, j)),
                pl.BlockSpec((1, tn), lambda i, j, k: (0, j)),
            ],
            out_specs=pl.BlockSpec((tm, tn), lambda i, j, k: (i, j)),
            scratch_shapes=[pltpu.VMEM((tm, tn), jnp.float32)],
        ),
        compiler_params=pltpu.CompilerParams(
            dimension_semantics=("parallel", "parallel", "arbitrary"),
            vmem_limit_bytes=48 * 1024 * 1024,   # <= v7x 64 MiB physical VMEM
        ),
        cost_estimate=pl.CostEstimate(
            flops=flops, transcendentals=0, bytes_accessed=bytes_accessed),
    )(x2d, w, b2d)


# ---------------------- Attention + output-proj kernel ---------------------- #
def _attn_proj_kernel(q_ref, k_ref, v_ref, wo_ref, bo_ref, o_ref, *, num_heads):
    # q_ref: (1, tq, C) bf16   (qk_scale already folded into the q projection)
    # k_ref, v_ref: (1, M, C) bf16 (resident across q tiles)
    # wo_ref: (H, D, C) bf16 (resident), bo_ref: (1, C) f32 (resident)
    # o_ref: (1, tq, C) f32
    q = q_ref[0]                       # (tq, C)
    k = k_ref[0]                       # (M, C)
    v = v_ref[0]                       # (M, C)
    tq, C = q.shape
    D = C // num_heads

    # f32 accumulator for the fused output projection (lane-dense, one store).
    acc = jnp.zeros((tq, C), jnp.float32)

    # Static unroll over heads: all heads share one DMA of q/k/v; each head's
    # attention output is folded into `acc` through its (D, C) slice of wo,
    # so per-head partials die immediately (no concat, no lane interleave).
    for h in range(num_heads):
        sl = slice(h * D, (h + 1) * D)
        qh = q[:, sl]                  # (tq, D) bf16
        kh = k[:, sl]                  # (M, D) bf16
        vh = v[:, sl]                  # (M, D) bf16

        # Scores: contract last dims directly (no explicit transpose), f32.
        s = jax.lax.dot_general(
            qh, kh, (((1,), (1,)), ((), ())),
            preferred_element_type=jnp.float32)            # (tq, M)

        # Softmax over the memory axis, all math in f32.
        s = s - jnp.max(s, axis=-1, keepdims=True)
        p = jnp.exp(s)
        l = jnp.sum(p, axis=-1, keepdims=True)             # (tq, 1)

        o_h = jnp.dot(p.astype(vh.dtype), vh,
                      preferred_element_type=jnp.float32)  # (tq, D)
        o_h = o_h / l                                      # exact normalization

        # Fused output projection for this head: (tq, D) @ (D, C).
        acc = acc + jnp.dot(o_h.astype(wo_ref.dtype), wo_ref[h],
                            preferred_element_type=jnp.float32)

    o_ref[0] = (acc + bo_ref[...].astype(jnp.float32)).astype(o_ref.dtype)


def attention_proj(qp, kp, vp, wo_r, bo2d, num_heads):
    """qp: (B, N, C) bf16, kp/vp: (B, M, C) bf16, wo_r: (H, D, C) bf16,
    bo2d: (1, C) f32  ->  (B, N, C) f32 (attention + output projection)."""
    B, N, C = qp.shape
    M = kp.shape[1]
    H = num_heads
    D = C // H

    # Tile the query dimension: k/v/wo stay resident across q tiles, so large
    # N neither blows VMEM nor starves the pipeline.
    tq = _pick_tile(N, (256, 128, 64, 32, 16, 8))
    grid = (B, N // tq)

    kernel = functools.partial(_attn_proj_kernel, num_heads=H)

    flops = B * (2 * N * M * C      # scores (all heads)
                 + 2 * N * M * C    # attn @ v
                 + 2 * N * C * C)   # fused output projection
    bytes_accessed = (B * N * C * qp.dtype.itemsize
                      + 2 * B * M * C * kp.dtype.itemsize
                      + H * D * C * wo_r.dtype.itemsize
                      + C * 4
                      + B * N * C * 4)

    return pl.pallas_call(
        kernel,
        out_shape=jax.ShapeDtypeStruct((B, N, C), jnp.float32),
        grid_spec=pltpu.PrefetchScalarGridSpec(
            num_scalar_prefetch=0,
            grid=grid,
            in_specs=[
                pl.BlockSpec((1, tq, C), lambda b, qi: (b, qi, 0)),
                pl.BlockSpec((1, M, C), lambda b, qi: (b, 0, 0)),
                pl.BlockSpec((1, M, C), lambda b, qi: (b, 0, 0)),
                pl.BlockSpec((H, D, C), lambda b, qi: (0, 0, 0)),
                pl.BlockSpec((1, C), lambda b, qi: (0, 0)),
            ],
            out_specs=pl.BlockSpec((1, tq, C), lambda b, qi: (b, qi, 0)),
        ),
        compiler_params=pltpu.CompilerParams(
            dimension_semantics=("parallel", "parallel"),
            vmem_limit_bytes=48 * 1024 * 1024,
        ),
        cost_estimate=pl.CostEstimate(
            flops=flops, transcendentals=B * H * N * M,
            bytes_accessed=bytes_accessed),
    )(qp, kp, vp, wo_r, bo2d)


# ------------------------------ Module wrapper ------------------------------ #
class AttentionPallas:
    def __init__(self, dim, num_heads=8, qkv_bias=False, qk_scale=None, key=None):
        assert dim % num_heads == 0
        self.dim = dim
        self.num_heads = num_heads
        head_dim = dim // num_heads
        self.scale = qk_scale or head_dim ** (-0.5)

        key = jax.random.PRNGKey(42) if key is None else key
        ks = jax.random.split(key, 8)
        init = 0.02
        # f32 master weights (used by the pure-JAX reference), stored as
        # (C_in, C_out), i.e. torch weight transposed.
        self.wq = jax.random.normal(ks[0], (dim, dim), jnp.float32) * init
        self.wk = jax.random.normal(ks[1], (dim, dim), jnp.float32) * init
        self.wv = jax.random.normal(ks[2], (dim, dim), jnp.float32) * init
        self.wo = jax.random.normal(ks[3], (dim, dim), jnp.float32) * init
        if qkv_bias:
            self.bq = jax.random.normal(ks[4], (dim,), jnp.float32) * init
            self.bk = jax.random.normal(ks[5], (dim,), jnp.float32) * init
            self.bv = jax.random.normal(ks[6], (dim,), jnp.float32) * init
        else:
            zero = jnp.zeros((dim,), jnp.float32)
            self.bq, self.bk, self.bv = zero, zero, zero
        self.bo = jax.random.normal(ks[7], (dim,), jnp.float32) * init

        # Kernel copies: bf16 MXU operands, qk_scale folded into the q proj
        # (scale is 2^-k for power-of-two head dims -> no extra rounding),
        # biases kept in f32 (added after the f32 accumulator).
        cdt = jnp.bfloat16
        self.wq_k = (self.wq * self.scale).astype(cdt)
        self.wk_k = self.wk.astype(cdt)
        self.wv_k = self.wv.astype(cdt)
        self.bq_s = self.bq * self.scale
        # wo pre-reshaped to (H, D, C) so the fused-proj kernel indexes heads
        # on the leading axis (no lane slicing of the weight).
        self.wo_r = self.wo.reshape(num_heads, head_dim, dim).astype(cdt)
        self.bo2d = self.bo.reshape(1, dim)

    def __call__(self, q, k, v):
        B, N, C = q.shape
        assert k.shape == v.shape
        _, M, _ = k.shape
        cdt = jnp.bfloat16

        # Projections in bf16 (f32 accumulation inside the kernel); outputs
        # stay in (B, seq, C) layout -- no head transposes anywhere, heads are
        # split on the lane axis inside the attention kernel.
        qp = linear(q.reshape(B * N, C).astype(cdt), self.wq_k, self.bq_s,
                    out_dtype=cdt).reshape(B, N, C)
        kp = linear(k.reshape(B * M, C).astype(cdt), self.wk_k, self.bk,
                    out_dtype=cdt).reshape(B, M, C)
        vp = linear(v.reshape(B * M, C).astype(cdt), self.wv_k, self.bv,
                    out_dtype=cdt).reshape(B, M, C)

        # Attention + fused output projection in a single pallas_call; final
        # output in f32 to match the PyTorch module.
        out = attention_proj(qp, kp, vp, self.wo_r, self.bo2d, self.num_heads)
        # attn_drop / proj_drop are p=0.0 -> identity.
        return out


# ------------------------------- Reference ---------------------------------- #
def reference_forward(mod, q, k, v):
    """Pure-JAX f32 replica of the PyTorch module forward."""
    B, N, C = q.shape
    _, M, _ = k.shape
    H, D = mod.num_heads, C // mod.num_heads
    qp = (q.reshape(B * N, C) @ mod.wq + mod.bq).reshape(B, N, H, D)
    kp = (k.reshape(B * M, C) @ mod.wk + mod.bk).reshape(B, M, H, D)
    vp = (v.reshape(B * M, C) @ mod.wv + mod.bv).reshape(B, M, H, D)
    attn = jnp.einsum("bnkc,bmkc->bknm", qp, kp) * mod.scale
    attn = jax.nn.softmax(attn, axis=-1)
    x = jnp.einsum("bknm,bmkc->bnkc", attn, vp).reshape(B, N, C)
    return (x.reshape(B * N, C) @ mod.wo + mod.bo).reshape(B, N, C)


if __name__ == "__main__":
    B, N, M, C, H = 2, 16, 8, 128, 8
    key = jax.random.PRNGKey(0)
    kq, kk, kv = jax.random.split(key, 3)
    q = jax.random.normal(kq, (B, N, C), jnp.float32)
    k = jax.random.normal(kk, (B, M, C), jnp.float32)
    v = jax.random.normal(kv, (B, M, C), jnp.float32)

    mod = AttentionPallas(dim=C, num_heads=H)
    out = jax.block_until_ready(mod(q, k, v))

    ref = reference_forward(mod, q, k, v)
    assert out.shape == (B, N, C)
    assert out.dtype == jnp.float32
    # Tolerance covers bf16 MXU operands / bf16 intermediates (f32 accumulation,
    # f32 softmax, exact normalization): observed error is ~1e-3 relative.
    assert jnp.allclose(out, ref, atol=3e-3, rtol=3e-2), "mismatch vs pure-JAX reference"
    print("KERNEL_OK")
</pallas_src>

<mosaic_0001>
module attributes {stable_mosaic.version = 11 : i64} {
  func.func @_linear_kernel(%arg0: i32, %arg1: i32, %arg2: i32, %arg3: memref<32x128xbf16, #tpu.memory_space<vmem>>, %arg4: memref<128x128xbf16, #tpu.memory_space<vmem>>, %arg5: memref<1x128xf32, #tpu.memory_space<vmem>>, %arg6: memref<32x128xbf16, #tpu.memory_space<vmem>>, %arg7: memref<32x128xf32, #tpu.memory_space<vmem>>) attributes {dimension_semantics = [#tpu.dimension_semantics<parallel>, #tpu.dimension_semantics<parallel>, #tpu.dimension_semantics<arbitrary>], iteration_bounds = array<i64: 1, 1, 1>, scalar_prefetch = 0 : i64, scratch_operands = 1 : i64, tpu.core_type = #tpu.core_type<tc>, window_params = [{transform_indices = @transform_0, window_bounds = array<i64: 32, 128>}, {transform_indices = @transform_1, window_bounds = array<i64: 128, 128>}, {transform_indices = @transform_2, window_bounds = array<i64: 1, 128>}, {transform_indices = @transform_3, window_bounds = array<i64: 32, 128>}]} {
    %c0_i32 = arith.constant 0 : i32
    %0 = arith.cmpi eq, %arg2, %c0_i32 : i32
    %1 = arith.extui %0 : i1 to i32
    %c0_i32_0 = arith.constant 0 : i32
    %2 = arith.cmpi ne, %1, %c0_i32_0 : i32
    scf.if %2 {
      %cst_10 = arith.constant 0.000000e+00 : f32
      %12 = vector.broadcast %cst_10 : f32 to vector<32x128xf32>
      %c0_11 = arith.constant 0 : index
      %c0_12 = arith.constant 0 : index
      %13 = vector.load %arg7[%c0_11, %c0_12] : memref<32x128xf32, #tpu.memory_space<vmem>>, vector<32x128xf32>
      tpu.vector_store %arg7[%c0_11, %c0_12], %12 {strides = array<i32>} : memref<32x128xf32, #tpu.memory_space<vmem>>, vector<32x128xf32>,
    } else {
    }
    %c0 = arith.constant 0 : index
    %c0_1 = arith.constant 0 : index
    %3 = vector.load %arg7[%c0, %c0_1] : memref<32x128xf32, #tpu.memory_space<vmem>>, vector<32x128xf32>
    %c0_2 = arith.constant 0 : index
    %c0_3 = arith.constant 0 : index
    %4 = vector.load %arg3[%c0_2, %c0_3] : memref<32x128xbf16, #tpu.memory_space<vmem>>, vector<32x128xbf16>
    %c0_4 = arith.constant 0 : index
    %c0_5 = arith.constant 0 : index
    %5 = vector.load %arg4[%c0_4, %c0_5] : memref<128x128xbf16, #tpu.memory_space<vmem>>, vector<128x128xbf16>
    %cst = arith.constant dense<0.000000e+00> : vector<32x128xf32>
    %6 = tpu.matmul %4, %5, %cst {dimension_numbers = #tpu.dot_dimension_numbers<[1], [0], [0], [1], [0, 0, 1, 1], [], []>} : vector<32x128xbf16>, vector<128x128xbf16>, vector<32x128xf32> -> vector<32x128xf32>
    %7 = arith.addf %3, %6 : vector<32x128xf32>
    %c0_6 = arith.constant 0 : index
    %c0_7 = arith.constant 0 : index
    %8 = vector.load %arg7[%c0_6, %c0_7] : memref<32x128xf32, #tpu.memory_space<vmem>>, vector<32x128xf32>
    tpu.vector_store %arg7[%c0_6, %c0_7], %7 {strides = array<i32>} : memref<32x128xf32, #tpu.memory_space<vmem>>, vector<32x128xf32>,
    %c0_i32_8 = arith.constant 0 : i32
    %9 = arith.cmpi eq, %arg2, %c0_i32_8 : i32
    %10 = arith.extui %9 : i1 to i32
    %c0_i32_9 = arith.constant 0 : i32
    %11 = arith.cmpi ne, %10, %c0_i32_9 : i32
    scf.if %11 {
      %c0_10 = arith.constant 0 : index
      %c0_11 = arith.constant 0 : index
      %12 = vector.load %arg7[%c0_10, %c0_11] : memref<32x128xf32, #tpu.memory_space<vmem>>, vector<32x128xf32>
      %c0_12 = arith.constant 0 : index
      %c0_13 = arith.constant 0 : index
      %13 = vector.load %arg5[%c0_12, %c0_13] : memref<1x128xf32, #tpu.memory_space<vmem>>, vector<1x128xf32>
      %14 = vector.broadcast %13 : vector<1x128xf32> to vector<32x128xf32>
      %15 = arith.addf %12, %14 : vector<32x128xf32>
      %16 = arith.truncf %15 : vector<32x128xf32> to vector<32x128xbf16>
      %c0_14 = arith.constant 0 : index
      %c0_15 = arith.constant 0 : index
      %17 = vector.load %arg6[%c0_14, %c0_15] : memref<32x128xbf16, #tpu.memory_space<vmem>>, vector<32x128xbf16>
      tpu.vector_store %arg6[%c0_14, %c0_15], %16 {strides = array<i32>} : memref<32x128xbf16, #tpu.memory_space<vmem>>, vector<32x128xbf16>,
    } else {
    }
    return
  }
  func.func @transform_0(%arg0: i32, %arg1: i32, %arg2: i32) -> (i32, i32) {
    %c0_i32 = arith.constant 0 : i32
    return %arg0, %arg2 : i32, i32
  }
  func.func @transform_1(%arg0: i32, %arg1: i32, %arg2: i32) -> (i32, i32) {
    %c0_i32 = arith.constant 0 : i32
    return %arg2, %arg1 : i32, i32
  }
  func.func @transform_2(%arg0: i32, %arg1: i32, %arg2: i32) -> (i32, i32) {
    %c0_i32 = arith.constant 0 : i32
    %c0_i32_0 = arith.constant 0 : i32
    return %c0_i32, %arg1 : i32, i32
  }
  func.func @transform_3(%arg0: i32, %arg1: i32, %arg2: i32) -> (i32, i32) {
    %c0_i32 = arith.constant 0 : i32
    return %arg0, %arg1 : i32, i32
  }
}

</mosaic_0001>

<bundles_post_ra>
// kernel: tpu_custom_call.1
= control target key start
LH: loop header
LB: loop body
LE: loop exit
PB: predicated region body
PF: predicated region fallthrough
CT: control target
= control target key end

     0   :  { %8 = vsyncpa [#allocation4], 0  ;;  %s408_s0 = inlined_call_operand.hbm [shape: bf16[32,128], index: 0, kind: input, shape index: {}]   ;;  %s409_s1 = inlined_call_operand.hbm [shape: bf16[128,128], index: 1, kind: input, shape index: {}]   ;;  %s410_s2 = inlined_call_operand.vmem [shape: f32[1,128], index: 2, kind: input, shape index: {}]   ;;  %s411_s3 = inlined_call_operand.hbm [shape: bf16[32,128], index: 3, kind: output, shape index: {}]  }
   0x1   :  { %9 = vsyncpa [#allocation7], 0 }
   0x2   :  { %10 = vsyncpa [#allocation5], 0  ;;  %s15_s14 = sshll.u32 %s408_s0, 4  ;;  %s362_s15 = smov [#allocation3]   ;;  %s16_s14 = int_to_ptr.hbm [resolvable:$true] %s15_s14 }
   0x3   :  { %s17_s16 = sshll.u32 %s362_s15, 4  ;;  %s28_s19 = sshll.u32 %s409_s1, 4  ;;  %s18_s16 = int_to_ptr.vmem [resolvable:$true] %s17_s16  ;;  %s29_s19 = int_to_ptr.hbm [resolvable:$true] %s28_s19 }
   0x4   :  { %s363_s20 = smov 64   ;;  %s364_s21 = smov 4  }
   0x5   :  { %23 = dma.hbm_to_vmem [thread:$0]  %s16_s14, 256, %s18_s16, [#allocation4], %s363_s20, %s363_s20, %s364_s21  }
   0x6   :  { %s365_s22 = smov [#allocation6]  }
   0x7   :  { %s30_s23 = sshll.u32 %s365_s22, 4  ;;  %s31_s23 = int_to_ptr.vmem [resolvable:$true] %s30_s23 }
   0x8   :  { %36 = dma.hbm_to_vmem [thread:$0]  %s29_s19, 1024, %s31_s23, [#allocation7], %s363_s20, %s363_s20, %s364_s21  }
   0x9   :  { %356 = dma.done.wait [#allocation4], 256  }
   0xa   :  { %357 = vsyncadd [#allocation4], 4294967040 }
   0xb   :  { %358 = dma.done.wait [#allocation7], 1024  }
   0xc   :  { %359 = vsyncadd [#allocation7], 4294966272  ;;  %v258_v0 = vld [vmem:[#allocation6 + $0x38] sm:$0xff]  ;;  %v257_v1 = vld [vmem:[#allocation6 + $0x30] sm:$0xff]  ;;  %s366_s24 = smov [#allocation8]   ;;  %s195_s28 = sshll.u32 %s411_s3, 4  ;;  %s196_s28 = int_to_ptr.hbm [resolvable:$true] %s195_s28 }
   0xd   :  { %139 = vmatpush.bf16.msra.mxu0 %v258_v0  ;;  %270 = vmatpush.bf16.msra.mxu1 %v258_v0  ;;  %v256_v2 = vld [vmem:[#allocation6 + $0x28] sm:$0xff]  ;;  %v255_v3 = vld [vmem:[#allocation6 + $0x20] sm:$0xff]  ;;  %v254_v4 = vld [vmem:[#allocation6 + $0x18] sm:$0xff]  ;;  %s193_s25 = sshll.u32 %s366_s24, 4  ;;  %s194_s25 = int_to_ptr.vmem [resolvable:$true] %s193_s25 }
   0xe   :  { %v253_v5 = vld [vmem:[#allocation6 + $0x10] sm:$0xff]  ;;  %v252_v6 = vld [vmem:[#allocation6 + $0x8] sm:$0xff]  ;;  %v251_v7 = vld [vmem:[#allocation6] sm:$0xff] }
   0xf   :  { %v249_v8 = vld [vmem:[#allocation3] sm:$0xff]  ;;  %v250_v9 = vld [vmem:[#allocation3 + $0x8] sm:$0xff] }
  0x10   :  { %v283_v12 = vld [vmem:[%s410_s2] ss:$0 sm:$0xff] }
  0x11   :  { %140 = vmatpush.bf16.msra.mxu0 %v257_v1  ;;  %271 = vmatpush.bf16.msra.mxu1 %v257_v1 }
  0x15   :  { %141 = vmatpush.bf16.msra.mxu0 %v256_v2  ;;  %272 = vmatpush.bf16.msra.mxu1 %v256_v2 }
  0x19   :  { %142 = vmatpush.bf16.msra.mxu0 %v255_v3  ;;  %273 = vmatpush.bf16.msra.mxu1 %v255_v3 }
  0x1d   :  { %143 = vmatpush.bf16.msra.mxu0 %v254_v4  ;;  %274 = vmatpush.bf16.msra.mxu1 %v254_v4 }
  0x21   :  { %144 = vmatpush.bf16.msra.mxu0 %v253_v5  ;;  %275 = vmatpush.bf16.msra.mxu1 %v253_v5 }
  0x25   :  { %145 = vmatpush.bf16.msra.mxu0 %v252_v6  ;;  %276 = vmatpush.bf16.msra.mxu1 %v252_v6 }
  0x29   :  { %146 = vmatpush.bf16.msra.mxu0 %v251_v7  ;;  %277 = vmatpush.bf16.msra.mxu1 %v251_v7 }
  0x2c   :  { %147 = vmatmul.bf16.vlgmr.msra.gmra.mxu0 %v249_v8  ;;  %152 = vmatmul.bf16.vlgmr.msra.gmra.mxu1 %v250_v9 }
  0xa9   :  { %v148_v10 = vpop.f32.mrf.mxu0  ;;  %v153_v11 = vpop.f32.mrf.mxu1 }
  0xaa   :  { %v177_v15 = vadd.f32 %v283_v12, %v148_v10  ;;  %v179_v16 = vadd.f32 %v283_v12, %v153_v11 }
  0xb1   :  { %v150_v13 = vpop.f32.mrf.mxu0  ;;  %v155_v14 = vpop.f32.mrf.mxu1 }
  0xb2   :  { %v178_v17 = vadd.f32 %v283_v12, %v150_v13  ;;  %v180_v18 = vadd.f32 %v283_v12, %v155_v14 }
  0xb4   :  { %v262_v19 = vpack.c.bf16 %v178_v17, %v177_v15  ;;  %v267_v20 = vpack.c.bf16 %v180_v18, %v179_v16 }
  0xb6   :  { %263 = vst [vmem:[#allocation8] sm:$0xff] %v262_v19  }
  0xb7   :  { %269 = vst [vmem:[#allocation8 + $0x8] sm:$0xff] %v267_v20  }
  0xb8   :  { %201 = dma.vmem_to_hbm [thread:$0]  %s194_s25, 256, %s196_s28, [#allocation5], %s363_s20, %s363_s20, %s364_s21  }
  0xb9   :  { %360 = dma.done.wait [#allocation5], 256  }
  0xba   :  { %361 = vsyncadd [#allocation5], 4294967040 }
  0xbb   :  { %206 = vsyncpa [#allocation4], 1 }
  0xbc   :  { %207 = vsyncpa [#allocation7], 1 }
  0xbd   :  { %208 = vsyncpa [#allocation5], 1 }

</bundles_post_ra>
